<compile_context>
chip_gen: v7x
topology: tpu7x:2x2x1
jax: 0.10.0
libtpu: 0.0.40
codegen_flags: <defaults>
</compile_context>

<pallas_src>
import functools
from math import sqrt

import jax
import jax.numpy as jnp
from jax.experimental import pallas as pl
from jax.experimental.pallas import tpu as pltpu


def _mha_kernel(xq_ref, xkv_ref, wq_ref, wk_ref, wv_ref, wo_ref,
                bq_ref, bk_ref, bv_ref, bo_ref, o_ref,
                *, batch_block: int, lq: int, lkv: int,
                num_heads: int, head_dim: int):
    Bb, Lq, Lkv, H, Dh = batch_block, lq, lkv, num_heads, head_dim

    xq = xq_ref[...]      # (Bb*Lq,  Cq)   bf16
    xkv = xkv_ref[...]    # (Bb*Lkv, Ckv)  bf16

    # ---- Lane-dense 2D projections (bf16 operands, f32 MXU accumulation). ----
    # Scale 1/sqrt(Dh) is already folded into wq / bq.
    q2 = (jnp.dot(xq, wq_ref[...], preferred_element_type=jnp.float32)
          + bq_ref[...]).astype(jnp.bfloat16)                     # (Bb*Lq,  E)
    k2 = (jnp.dot(xkv, wk_ref[...], preferred_element_type=jnp.float32)
          + bk_ref[...]).astype(jnp.bfloat16)                     # (Bb*Lkv, E)
    v2 = (jnp.dot(xkv, wv_ref[...], preferred_element_type=jnp.float32)
          + bv_ref[...]).astype(jnp.bfloat16)                     # (Bb*Lkv, E)

    # ---- Single head-split relayout: static lane slices + major-dim stack. ----
    def split_heads(x):
        return jnp.stack([x[:, h * Dh:(h + 1) * Dh] for h in range(H)], axis=0)

    q_h = split_heads(q2)   # (H, Bb*Lq,  Dh)
    k_h = split_heads(k2)   # (H, Bb*Lkv, Dh)
    v_h = split_heads(v2)   # (H, Bb*Lkv, Dh)

    # ---- Attention core, head-batched einsums, softmax in f32. ----
    ctx_rows = []
    for b in range(Bb):                         # static unroll over batch block
        qb = q_h[:, b * Lq:(b + 1) * Lq, :]
        kb = k_h[:, b * Lkv:(b + 1) * Lkv, :]
        vb = v_h[:, b * Lkv:(b + 1) * Lkv, :]

        s = jnp.einsum("hqd,hkd->hqk", qb, kb,
                       preferred_element_type=jnp.float32)        # (H, Lq, Lkv)
        s = s - jnp.max(s, axis=-1, keepdims=True)
        p = jnp.exp(s)
        denom = jnp.sum(p, axis=-1, keepdims=True)
        p = p * pl.reciprocal(denom, approx=True)                 # EUP, not VALU div
        ctx = jnp.einsum("hqk,hkd->hqd", p.astype(jnp.bfloat16), vb,
                         preferred_element_type=jnp.float32)      # (H, Lq, Dh)
        # Merge heads back to a lane-dense (Lq, E) row block (lane concat).
        ctx_rows.append(jnp.concatenate([ctx[h] for h in range(H)], axis=-1))

    ctx2 = ctx_rows[0] if Bb == 1 else jnp.concatenate(ctx_rows, axis=0)  # (Bb*Lq, E)

    # ---- Fused output projection: one (Bb*Lq, E) @ (E, E) matmul. ----
    out = jnp.dot(ctx2.astype(jnp.bfloat16), wo_ref[...],
                  preferred_element_type=jnp.float32) + bo_ref[...]
    o_ref[...] = out.astype(o_ref.dtype)


def _pick_batch_block(batch: int) -> int:
    # Prefer blocking several batch elements per grid step (amortize the
    # ~0.35 us/step pipeline overhead), but keep >= 2 grid steps so the two
    # v7x TensorCores both get work from the "parallel" batch axis.
    for bb in (8, 4, 2):
        if batch % bb == 0 and batch // bb >= 2:
            return bb
    return 1


def multi_head_attention(x_q, x_kv, params, *, num_heads: int, batch_block=None):
    """Pallas implementation of nn.MultiheadAttention(kdim=vdim=num_kv_channels,
    batch_first=True) forward with pad_mask=None, attn_mask=None (eval mode)."""
    B, Lq, E = x_q.shape
    _, Lkv, Ckv = x_kv.shape
    assert E % num_heads == 0
    H = num_heads
    Dh = E // H
    scale = 1.0 / sqrt(Dh)

    Bb = _pick_batch_block(B) if batch_block is None else batch_block
    assert B % Bb == 0
    # (8,128) rule: block rows must be a sublane multiple or the full extent.
    assert (Bb * Lq) % 8 == 0 or Bb == B
    assert (Bb * Lkv) % 8 == 0 or Bb == B

    # Trace-time weight prep: pre-transpose to lane-dense 2D, cast to bf16,
    # fold the 1/sqrt(Dh) scale into Wq / bq. Biases stay f32 (added after the
    # f32-accumulated matmul).
    wq = (params["wq"].T * scale).astype(jnp.bfloat16)   # (Cq,  E) scaled
    wk = params["wk"].T.astype(jnp.bfloat16)             # (Ckv, E)
    wv = params["wv"].T.astype(jnp.bfloat16)             # (Ckv, E)
    wo = params["wo"].T.astype(jnp.bfloat16)             # (E,   E)
    bq = (params["bq"] * scale).astype(jnp.float32)      # (1, E) scaled
    bk = params["bk"].astype(jnp.float32)                # (1, E)
    bv = params["bv"].astype(jnp.float32)                # (1, E)
    bo = params["bo"].astype(jnp.float32)                # (1, E)

    # Flatten (B, L, C) -> (B*L, C) at trace time: free, and it gives the
    # kernel lane-dense 2D activation tiles with the batch block on sublanes.
    xq2 = x_q.reshape(B * Lq, E).astype(jnp.bfloat16)
    xkv2 = x_kv.reshape(B * Lkv, Ckv).astype(jnp.bfloat16)

    kernel = functools.partial(_mha_kernel, batch_block=Bb, lq=Lq, lkv=Lkv,
                               num_heads=H, head_dim=Dh)

    def whole(arr):
        nd = arr.ndim
        return pl.BlockSpec(arr.shape, lambda i, _n=nd: (0,) * _n)

    out2 = pl.pallas_call(
        kernel,
        out_shape=jax.ShapeDtypeStruct((B * Lq, E), x_q.dtype),
        grid_spec=pltpu.PrefetchScalarGridSpec(
            num_scalar_prefetch=0,
            grid=(B // Bb,),
            in_specs=[
                pl.BlockSpec((Bb * Lq, E), lambda i: (i, 0)),      # x_q rows
                pl.BlockSpec((Bb * Lkv, Ckv), lambda i: (i, 0)),   # x_kv rows
                whole(wq), whole(wk), whole(wv), whole(wo),        # 2D weights
                whole(bq), whole(bk), whole(bv), whole(bo),        # (1, E) biases
            ],
            out_specs=pl.BlockSpec((Bb * Lq, E), lambda i: (i, 0)),
        ),
        compiler_params=pltpu.CompilerParams(dimension_semantics=("parallel",)),
    )(xq2, xkv2, wq, wk, wv, wo, bq, bk, bv, bo)
    return out2.reshape(B, Lq, E)


def _reference(x_q, x_kv, params, *, num_heads: int):
    """Pure-JAX f32 reference mirroring torch.nn.MultiheadAttention forward."""
    B, Lq, E = x_q.shape
    Dh = E // num_heads
    q = x_q @ params["wq"].T + params["bq"][0]
    k = x_kv @ params["wk"].T + params["bk"][0]
    v = x_kv @ params["wv"].T + params["bv"][0]
    q = q.reshape(B, Lq, num_heads, Dh).transpose(0, 2, 1, 3)
    k = k.reshape(B, -1, num_heads, Dh).transpose(0, 2, 1, 3)
    v = v.reshape(B, -1, num_heads, Dh).transpose(0, 2, 1, 3)
    s = jnp.einsum("bhqd,bhkd->bhqk", q, k) / jnp.sqrt(jnp.float32(Dh))
    p = jax.nn.softmax(s, axis=-1)
    ctx = jnp.einsum("bhqk,bhkd->bhqd", p, v).transpose(0, 2, 1, 3).reshape(B, Lq, E)
    return ctx @ params["wo"].T + params["bo"][0]


def init_params(key, num_q_channels, num_kv_channels):
    """Deterministic synthetic weights matching nn.MultiheadAttention shapes
    (kdim != embed_dim -> separate q/k/v projection weights)."""
    E, Ckv = num_q_channels, num_kv_channels
    ks = jax.random.split(key, 8)
    sc = 0.1
    return {
        "wq": sc * jax.random.normal(ks[0], (E, E), jnp.float32),
        "wk": sc * jax.random.normal(ks[1], (E, Ckv), jnp.float32),
        "wv": sc * jax.random.normal(ks[2], (E, Ckv), jnp.float32),
        "wo": sc * jax.random.normal(ks[3], (E, E), jnp.float32),
        "bq": sc * jax.random.normal(ks[4], (1, E), jnp.float32),
        "bk": sc * jax.random.normal(ks[5], (1, E), jnp.float32),
        "bv": sc * jax.random.normal(ks[6], (1, E), jnp.float32),
        "bo": sc * jax.random.normal(ks[7], (1, E), jnp.float32),
    }


if __name__ == "__main__":
    # Small shapes consistent with the module's forward.
    B, Lq, Lkv = 2, 8, 16
    num_q_channels, num_kv_channels, num_heads = 32, 24, 4

    key = jax.random.PRNGKey(0)
    k_q, k_kv, k_p = jax.random.split(key, 3)
    x_q = jax.random.normal(k_q, (B, Lq, num_q_channels), jnp.float32)
    x_kv = jax.random.normal(k_kv, (B, Lkv, num_kv_channels), jnp.float32)
    params = init_params(k_p, num_q_channels, num_kv_channels)

    out = multi_head_attention(x_q, x_kv, params, num_heads=num_heads)
    out = jax.block_until_ready(out)

    ref = _reference(x_q, x_kv, params, num_heads=num_heads)
    assert out.shape == (B, Lq, num_q_channels)
    # Tolerance accounts for bf16 matmul operands + the EUP approximate
    # reciprocal in the softmax normalization (f32 reference).
    assert jnp.allclose(out, ref, atol=3e-2, rtol=3e-2), "mismatch vs reference"

    print("KERNEL_OK")
</pallas_src>

<mosaic_0001>
module attributes {stable_mosaic.version = 11 : i64} {
  func.func @_mha_kernel(%arg0: i32, %arg1: memref<8x32xbf16, #tpu.memory_space<vmem>>, %arg2: memref<16x24xbf16, #tpu.memory_space<vmem>>, %arg3: memref<32x32xbf16, #tpu.memory_space<vmem>>, %arg4: memref<24x32xbf16, #tpu.memory_space<vmem>>, %arg5: memref<24x32xbf16, #tpu.memory_space<vmem>>, %arg6: memref<32x32xbf16, #tpu.memory_space<vmem>>, %arg7: memref<1x32xf32, #tpu.memory_space<vmem>>, %arg8: memref<1x32xf32, #tpu.memory_space<vmem>>, %arg9: memref<1x32xf32, #tpu.memory_space<vmem>>, %arg10: memref<1x32xf32, #tpu.memory_space<vmem>>, %arg11: memref<8x32xf32, #tpu.memory_space<vmem>>) attributes {dimension_semantics = [#tpu.dimension_semantics<parallel>], iteration_bounds = array<i64: 2>, scalar_prefetch = 0 : i64, scratch_operands = 0 : i64, tpu.core_type = #tpu.core_type<tc>, window_params = [{transform_indices = @transform_0, window_bounds = array<i64: 8, 32>}, {transform_indices = @transform_1, window_bounds = array<i64: 16, 24>}, {pipeline_mode = #tpu.pipeline_mode<synchronous>, transform_indices = @transform_2, window_bounds = array<i64: 32, 32>}, {pipeline_mode = #tpu.pipeline_mode<synchronous>, transform_indices = @transform_3, window_bounds = array<i64: 24, 32>}, {pipeline_mode = #tpu.pipeline_mode<synchronous>, transform_indices = @transform_4, window_bounds = array<i64: 24, 32>}, {pipeline_mode = #tpu.pipeline_mode<synchronous>, transform_indices = @transform_5, window_bounds = array<i64: 32, 32>}, {pipeline_mode = #tpu.pipeline_mode<synchronous>, transform_indices = @transform_6, window_bounds = array<i64: 1, 32>}, {pipeline_mode = #tpu.pipeline_mode<synchronous>, transform_indices = @transform_7, window_bounds = array<i64: 1, 32>}, {pipeline_mode = #tpu.pipeline_mode<synchronous>, transform_indices = @transform_8, window_bounds = array<i64: 1, 32>}, {pipeline_mode = #tpu.pipeline_mode<synchronous>, transform_indices = @transform_9, window_bounds = array<i64: 1, 32>}, {transform_indices = @transform_10, window_bounds = array<i64: 8, 32>}]} {
    %c0 = arith.constant 0 : index
    %c0_0 = arith.constant 0 : index
    %0 = vector.load %arg1[%c0, %c0_0] : memref<8x32xbf16, #tpu.memory_space<vmem>>, vector<8x32xbf16>
    %c0_1 = arith.constant 0 : index
    %c0_2 = arith.constant 0 : index
    %1 = vector.load %arg2[%c0_1, %c0_2] : memref<16x24xbf16, #tpu.memory_space<vmem>>, vector<16x24xbf16>
    %c0_3 = arith.constant 0 : index
    %c0_4 = arith.constant 0 : index
    %2 = vector.load %arg3[%c0_3, %c0_4] : memref<32x32xbf16, #tpu.memory_space<vmem>>, vector<32x32xbf16>
    %cst = arith.constant dense<0.000000e+00> : vector<8x32xf32>
    %3 = tpu.matmul %0, %2, %cst {dimension_numbers = #tpu.dot_dimension_numbers<[1], [0], [0], [1], [0, 0, 1, 1], [], []>} : vector<8x32xbf16>, vector<32x32xbf16>, vector<8x32xf32> -> vector<8x32xf32>
    %c0_5 = arith.constant 0 : index
    %c0_6 = arith.constant 0 : index
    %4 = vector.load %arg7[%c0_5, %c0_6] : memref<1x32xf32, #tpu.memory_space<vmem>>, vector<1x32xf32>
    %5 = vector.broadcast %4 : vector<1x32xf32> to vector<8x32xf32>
    %6 = arith.addf %3, %5 : vector<8x32xf32>
    %7 = arith.truncf %6 : vector<8x32xf32> to vector<8x32xbf16>
    %c0_7 = arith.constant 0 : index
    %c0_8 = arith.constant 0 : index
    %8 = vector.load %arg4[%c0_7, %c0_8] : memref<24x32xbf16, #tpu.memory_space<vmem>>, vector<24x32xbf16>
    %cst_9 = arith.constant dense<0.000000e+00> : vector<16x32xf32>
    %9 = tpu.matmul %1, %8, %cst_9 {dimension_numbers = #tpu.dot_dimension_numbers<[1], [0], [0], [1], [0, 0, 1, 1], [], []>} : vector<16x24xbf16>, vector<24x32xbf16>, vector<16x32xf32> -> vector<16x32xf32>
    %c0_10 = arith.constant 0 : index
    %c0_11 = arith.constant 0 : index
    %10 = vector.load %arg8[%c0_10, %c0_11] : memref<1x32xf32, #tpu.memory_space<vmem>>, vector<1x32xf32>
    %11 = vector.broadcast %10 : vector<1x32xf32> to vector<16x32xf32>
    %12 = arith.addf %9, %11 : vector<16x32xf32>
    %13 = arith.truncf %12 : vector<16x32xf32> to vector<16x32xbf16>
    %c0_12 = arith.constant 0 : index
    %c0_13 = arith.constant 0 : index
    %14 = vector.load %arg5[%c0_12, %c0_13] : memref<24x32xbf16, #tpu.memory_space<vmem>>, vector<24x32xbf16>
    %cst_14 = arith.constant dense<0.000000e+00> : vector<16x32xf32>
    %15 = tpu.matmul %1, %14, %cst_14 {dimension_numbers = #tpu.dot_dimension_numbers<[1], [0], [0], [1], [0, 0, 1, 1], [], []>} : vector<16x24xbf16>, vector<24x32xbf16>, vector<16x32xf32> -> vector<16x32xf32>
    %c0_15 = arith.constant 0 : index
    %c0_16 = arith.constant 0 : index
    %16 = vector.load %arg9[%c0_15, %c0_16] : memref<1x32xf32, #tpu.memory_space<vmem>>, vector<1x32xf32>
    %17 = vector.broadcast %16 : vector<1x32xf32> to vector<16x32xf32>
    %18 = arith.addf %15, %17 : vector<16x32xf32>
    %19 = arith.truncf %18 : vector<16x32xf32> to vector<16x32xbf16>
    %20 = vector.extract_strided_slice %7 {offsets = [0, 0], sizes = [8, 8], strides = [1, 1]} : vector<8x32xbf16> to vector<8x8xbf16>
    %21 = vector.extract_strided_slice %7 {offsets = [0, 8], sizes = [8, 8], strides = [1, 1]} : vector<8x32xbf16> to vector<8x8xbf16>
    %22 = vector.extract_strided_slice %7 {offsets = [0, 16], sizes = [8, 8], strides = [1, 1]} : vector<8x32xbf16> to vector<8x8xbf16>
    %23 = vector.extract_strided_slice %7 {offsets = [0, 24], sizes = [8, 8], strides = [1, 1]} : vector<8x32xbf16> to vector<8x8xbf16>
    %24 = vector.shape_cast %20 : vector<8x8xbf16> to vector<1x8x8xbf16>
    %25 = vector.shape_cast %21 : vector<8x8xbf16> to vector<1x8x8xbf16>
    %26 = vector.shape_cast %22 : vector<8x8xbf16> to vector<1x8x8xbf16>
    %27 = vector.shape_cast %23 : vector<8x8xbf16> to vector<1x8x8xbf16>
    %28 = tpu.concatenate %24, %25, %26, %27 in 0 : vector<1x8x8xbf16>, vector<1x8x8xbf16>, vector<1x8x8xbf16>, vector<1x8x8xbf16> -> vector<4x8x8xbf16>
    %29 = vector.extract_strided_slice %13 {offsets = [0, 0], sizes = [16, 8], strides = [1, 1]} : vector<16x32xbf16> to vector<16x8xbf16>
    %30 = vector.extract_strided_slice %13 {offsets = [0, 8], sizes = [16, 8], strides = [1, 1]} : vector<16x32xbf16> to vector<16x8xbf16>
    %31 = vector.extract_strided_slice %13 {offsets = [0, 16], sizes = [16, 8], strides = [1, 1]} : vector<16x32xbf16> to vector<16x8xbf16>
    %32 = vector.extract_strided_slice %13 {offsets = [0, 24], sizes = [16, 8], strides = [1, 1]} : vector<16x32xbf16> to vector<16x8xbf16>
    %33 = vector.shape_cast %29 : vector<16x8xbf16> to vector<1x16x8xbf16>
    %34 = vector.shape_cast %30 : vector<16x8xbf16> to vector<1x16x8xbf16>
    %35 = vector.shape_cast %31 : vector<16x8xbf16> to vector<1x16x8xbf16>
    %36 = vector.shape_cast %32 : vector<16x8xbf16> to vector<1x16x8xbf16>
    %37 = tpu.concatenate %33, %34, %35, %36 in 0 : vector<1x16x8xbf16>, vector<1x16x8xbf16>, vector<1x16x8xbf16>, vector<1x16x8xbf16> -> vector<4x16x8xbf16>
    %38 = vector.extract_strided_slice %19 {offsets = [0, 0], sizes = [16, 8], strides = [1, 1]} : vector<16x32xbf16> to vector<16x8xbf16>
    %39 = vector.extract_strided_slice %19 {offsets = [0, 8], sizes = [16, 8], strides = [1, 1]} : vector<16x32xbf16> to vector<16x8xbf16>
    %40 = vector.extract_strided_slice %19 {offsets = [0, 16], sizes = [16, 8], strides = [1, 1]} : vector<16x32xbf16> to vector<16x8xbf16>
    %41 = vector.extract_strided_slice %19 {offsets = [0, 24], sizes = [16, 8], strides = [1, 1]} : vector<16x32xbf16> to vector<16x8xbf16>
    %42 = vector.shape_cast %38 : vector<16x8xbf16> to vector<1x16x8xbf16>
    %43 = vector.shape_cast %39 : vector<16x8xbf16> to vector<1x16x8xbf16>
    %44 = vector.shape_cast %40 : vector<16x8xbf16> to vector<1x16x8xbf16>
    %45 = vector.shape_cast %41 : vector<16x8xbf16> to vector<1x16x8xbf16>
    %46 = tpu.concatenate %42, %43, %44, %45 in 0 : vector<1x16x8xbf16>, vector<1x16x8xbf16>, vector<1x16x8xbf16>, vector<1x16x8xbf16> -> vector<4x16x8xbf16>
    "tpu.trace_start"() <{level = 10 : i32, message = "hqd,hkd->hqk"}> : () -> ()
    %cst_17 = arith.constant dense<0.000000e+00> : vector<4x8x16xf32>
    %47 = tpu.matmul %28, %37, %cst_17 {dimension_numbers = #tpu.dot_dimension_numbers<[2], [2], [1], [1], [0, 0, 0, 1, 1, 1], [0], [0]>} : vector<4x8x8xbf16>, vector<4x16x8xbf16>, vector<4x8x16xf32> -> vector<4x8x16xf32>
    "tpu.trace_stop"() : () -> ()
    %cst_18 = arith.constant dense<0xFF800000> : vector<4x8xf32>
    %48 = vector.multi_reduction <maximumf>, %47, %cst_18 [2] : vector<4x8x16xf32> to vector<4x8xf32>
    %49 = vector.shape_cast %48 : vector<4x8xf32> to vector<4x8x1xf32>
    %50 = vector.broadcast %49 : vector<4x8x1xf32> to vector<4x8x16xf32>
    %51 = arith.subf %47, %50 : vector<4x8x16xf32>
    %52 = math.exp %51 : vector<4x8x16xf32>
    %cst_19 = arith.constant dense<0.000000e+00> : vector<4x8xf32>
    %53 = vector.multi_reduction <add>, %52, %cst_19 [2] : vector<4x8x16xf32> to vector<4x8xf32>
    %54 = vector.shape_cast %53 : vector<4x8xf32> to vector<4x8x1xf32>
    %55 = tpu.reciprocal %54 {approx = true} : vector<4x8x1xf32> -> vector<4x8x1xf32>
    %56 = vector.broadcast %55 : vector<4x8x1xf32> to vector<4x8x16xf32>
    %57 = arith.mulf %52, %56 : vector<4x8x16xf32>
    %58 = arith.truncf %57 : vector<4x8x16xf32> to vector<4x8x16xbf16>
    "tpu.trace_start"() <{level = 10 : i32, message = "hqk,hkd->hqd"}> : () -> ()
    %cst_20 = arith.constant dense<0.000000e+00> : vector<4x8x8xf32>
    %59 = tpu.matmul %58, %46, %cst_20 {dimension_numbers = #tpu.dot_dimension_numbers<[2], [1], [1], [2], [0, 0, 0, 1, 1, 2], [0], [0]>} : vector<4x8x16xbf16>, vector<4x16x8xbf16>, vector<4x8x8xf32> -> vector<4x8x8xf32>
    "tpu.trace_stop"() : () -> ()
    %60 = vector.extract_strided_slice %59 {offsets = [0, 0, 0], sizes = [1, 8, 8], strides = [1, 1, 1]} : vector<4x8x8xf32> to vector<1x8x8xf32>
    %61 = vector.shape_cast %60 : vector<1x8x8xf32> to vector<8x8xf32>
    %62 = vector.extract_strided_slice %59 {offsets = [1, 0, 0], sizes = [1, 8, 8], strides = [1, 1, 1]} : vector<4x8x8xf32> to vector<1x8x8xf32>
    %63 = vector.shape_cast %62 : vector<1x8x8xf32> to vector<8x8xf32>
    %64 = vector.extract_strided_slice %59 {offsets = [2, 0, 0], sizes = [1, 8, 8], strides = [1, 1, 1]} : vector<4x8x8xf32> to vector<1x8x8xf32>
    %65 = vector.shape_cast %64 : vector<1x8x8xf32> to vector<8x8xf32>
    %66 = vector.extract_strided_slice %59 {offsets = [3, 0, 0], sizes = [1, 8, 8], strides = [1, 1, 1]} : vector<4x8x8xf32> to vector<1x8x8xf32>
    %67 = vector.shape_cast %66 : vector<1x8x8xf32> to vector<8x8xf32>
    %68 = tpu.concatenate %61, %63, %65, %67 in 1 : vector<8x8xf32>, vector<8x8xf32>, vector<8x8xf32>, vector<8x8xf32> -> vector<8x32xf32>
    %69 = arith.truncf %68 : vector<8x32xf32> to vector<8x32xbf16>
    %c0_21 = arith.constant 0 : index
    %c0_22 = arith.constant 0 : index
    %70 = vector.load %arg6[%c0_21, %c0_22] : memref<32x32xbf16, #tpu.memory_space<vmem>>, vector<32x32xbf16>
    %cst_23 = arith.constant dense<0.000000e+00> : vector<8x32xf32>
    %71 = tpu.matmul %69, %70, %cst_23 {dimension_numbers = #tpu.dot_dimension_numbers<[1], [0], [0], [1], [0, 0, 1, 1], [], []>} : vector<8x32xbf16>, vector<32x32xbf16>, vector<8x32xf32> -> vector<8x32xf32>
    %c0_24 = arith.constant 0 : index
    %c0_25 = arith.constant 0 : index
    %72 = vector.load %arg10[%c0_24, %c0_25] : memref<1x32xf32, #tpu.memory_space<vmem>>, vector<1x32xf32>
    %73 = vector.broadcast %72 : vector<1x32xf32> to vector<8x32xf32>
    %74 = arith.addf %71, %73 : vector<8x32xf32>
    %c0_26 = arith.constant 0 : index
    %c0_27 = arith.constant 0 : index
    %75 = vector.load %arg11[%c0_26, %c0_27] : memref<8x32xf32, #tpu.memory_space<vmem>>, vector<8x32xf32>
    tpu.vector_store %arg11[%c0_26, %c0_27], %74 {strides = array<i32>} : memref<8x32xf32, #tpu.memory_space<vmem>>, vector<8x32xf32>,
    return
  }
  func.func @transform_0(%arg0: i32) -> (i32, i32) {
    %c0_i32 = arith.constant 0 : i32
    %c0_i32_0 = arith.constant 0 : i32
    return %arg0, %c0_i32 : i32, i32
  }
  func.func @transform_1(%arg0: i32) -> (i32, i32) {
    %c0_i32 = arith.constant 0 : i32
    %c0_i32_0 = arith.constant 0 : i32
    return %arg0, %c0_i32 : i32, i32
  }
  func.func @transform_2(%arg0: i32) -> (i32, i32) {
    %c0_i32 = arith.constant 0 : i32
    %c0_i32_0 = arith.constant 0 : i32
    %c0_i32_1 = arith.constant 0 : i32
    return %c0_i32, %c0_i32_0 : i32, i32
  }
  func.func @transform_3(%arg0: i32) -> (i32, i32) {
    %c0_i32 = arith.constant 0 : i32
    %c0_i32_0 = arith.constant 0 : i32
    %c0_i32_1 = arith.constant 0 : i32
    return %c0_i32, %c0_i32_0 : i32, i32
  }
  func.func @transform_4(%arg0: i32) -> (i32, i32) {
    %c0_i32 = arith.constant 0 : i32
    %c0_i32_0 = arith.constant 0 : i32
    %c0_i32_1 = arith.constant 0 : i32
    return %c0_i32, %c0_i32_0 : i32, i32
  }
  func.func @transform_5(%arg0: i32) -> (i32, i32) {
    %c0_i32 = arith.constant 0 : i32
    %c0_i32_0 = arith.constant 0 : i32
    %c0_i32_1 = arith.constant 0 : i32
    return %c0_i32, %c0_i32_0 : i32, i32
  }
  func.func @transform_6(%arg0: i32) -> (i32, i32) {
    %c0_i32 = arith.constant 0 : i32
    %c0_i32_0 = arith.constant 0 : i32
    %c0_i32_1 = arith.constant 0 : i32
    return %c0_i32, %c0_i32_0 : i32, i32
  }
  func.func @transform_7(%arg0: i32) -> (i32, i32) {
    %c0_i32 = arith.constant 0 : i32
    %c0_i32_0 = arith.constant 0 : i32
    %c0_i32_1 = arith.constant 0 : i32
    return %c0_i32, %c0_i32_0 : i32, i32
  }
  func.func @transform_8(%arg0: i32) -> (i32, i32) {
    %c0_i32 = arith.constant 0 : i32
    %c0_i32_0 = arith.constant 0 : i32
    %c0_i32_1 = arith.constant 0 : i32
    return %c0_i32, %c0_i32_0 : i32, i32
  }
  func.func @transform_9(%arg0: i32) -> (i32, i32) {
    %c0_i32 = arith.constant 0 : i32
    %c0_i32_0 = arith.constant 0 : i32
    %c0_i32_1 = arith.constant 0 : i32
    return %c0_i32, %c0_i32_0 : i32, i32
  }
  func.func @transform_10(%arg0: i32) -> (i32, i32) {
    %c0_i32 = arith.constant 0 : i32
    %c0_i32_0 = arith.constant 0 : i32
    return %arg0, %c0_i32 : i32, i32
  }
}

</mosaic_0001>

<bundles_post_ra>
// kernel: tpu_custom_call.1
= control target key start
LH: loop header
LB: loop body
LE: loop exit
PB: predicated region body
PF: predicated region fallthrough
CT: control target
= control target key end

     0   :  { %15 = vsyncpa [#allocation3], 0  ;;  %s2087_s0 = inlined_call_operand.hbm [shape: bf16[16,32], index: 0, kind: input, shape index: {}]   ;;  %s2088_s1 = inlined_call_operand.vmem [shape: bf16[32,24], index: 1, kind: input, shape index: {}]   ;;  %s2089_s2 = inlined_call_operand.vmem [shape: bf16[32,32], index: 2, kind: input, shape index: {}]   ;;  %s2090_s3 = inlined_call_operand.hbm [shape: bf16[24,32], index: 3, kind: input, shape index: {}]   ;;  %s2091_s4 = inlined_call_operand.hbm [shape: bf16[24,32], index: 4, kind: input, shape index: {}]   ;;  %s2092_s5 = inlined_call_operand.vmem [shape: bf16[32,32], index: 5, kind: input, shape index: {}]   ;;  %s2093_s6 = inlined_call_operand.vmem [shape: f32[1,32], index: 6, kind: input, shape index: {}]   ;;  %s2094_s7 = inlined_call_operand.vmem [shape: f32[1,32], index: 7, kind: input, shape index: {}]   ;;  %s2095_s8 = inlined_call_operand.vmem [shape: f32[1,32], index: 8, kind: input, shape index: {}]   ;;  %s2096_s9 = inlined_call_operand.vmem [shape: f32[1,32], index: 9, kind: input, shape index: {}]   ;;  %s2097_s10 = inlined_call_operand.hbm [shape: f32[16,32], index: 10, kind: output, shape index: {}]  }
   0x1   :  { %17 = vsyncpa [#allocation3 + $0x1], 0 }
   0x2   :  { %18 = vsyncpa [#allocation6], 0 }
   0x3   :  { %19 = vsyncpa [#allocation4], 0 }
   0x4   :  { %21 = vsyncpa [#allocation4 + $0x1], 0  ;;  %s1744_s13 = smov 0   ;;  %s1746_s14 = smov 0  }
   0x5   :  { %s1748_s15 = smov 0   ;;  %s1750_s16 = smov 0  }
   0x6 LB: > { %2103 = sst [smem:[#allocation12_spill]] %s1661_s13  ;;  %s1765_s17 = sadd.s32 4294967295, %s1673_s16   ;;  %s1673_s16 = sphi %s1750_s16, %s2123_s16   ;;  %s1669_s15 = sphi %s1748_s15, %s2122_s15   ;;  %s1665_s14 = sphi %s1746_s14, %s2121_s14   ;;  %s1661_s13 = sphi %s1744_s13, %s2120_s13  }
   0x7   : > { %s1264_s18 = sadd.s32 4294967294, %s1673_s16   ;;  %p47_p0 = scmp.ne.s32.totalorder %s1665_s14, %s1661_s13 }
   0x8   : > { %p2098_p1 = scmp.eq.s32.totalorder %s1765_s17, 0  ;;  %p271_p3 = scmp.eq.s32.totalorder %s1264_s18, 1 }
   0x9   : > { %p1265_p5 = scmp.ge.s32.totalorder %s1673_s16, 1  ;;  %p278_p7 = scmp.lt.s32.totalorder %s1673_s16, 3 }
   0xa   : > { %p1774_p4 = por %p2098_p1, %p47_p0  ;;  %p1779_p6 = por %p271_p3, %p47_p0 }
   0xb   : > { %p1784_p8 = pnand %p1265_p5, %p278_p7  ;;  %s1675_s22 = smov [#allocation5]  }
   0xc   : > { %s2104_s19 = scalar_select %p1774_p4, 1, 0 }
   0xd   : > { %s2105_s20 = scalar_select %p1779_p6, 1, 0 }
   0xe   : > { %s293_s23 = sshll.u32 %s1675_s22, 4  ;;  %p1427_p9 = pneg %p1784_p8  ;;  %s1788_s23 = int_to_ptr.vmem [resolvable:$true] %s293_s23 }
   0xf   : > { %2106 = sst [smem:[#allocation13_spill]] %s2105_s20  ;;  %s1676_s25 = smov [#allocation7]  }
  0x10   : > { %p1795_p11 = pnand %p1427_p9, %p2098_p1  ;;  %s306_s26 = sshll.u32 %s1676_s25, 4  ;;  %s1799_s26 = int_to_ptr.vmem [resolvable:$true] %s306_s26 }
  0x11   : > { %s1517_s29 = scalar_lea.hbm %s2090_s3, 192 }
  0x12   : > { %p1518_p12 = scmp.ne.s32.totalorder %s2090_s3, %s1517_s29  ;;  %p1519_p13 = pneg %p1795_p11 }
  0x13   : > { %p1524_p5 = scmp.lt.u32.totalorder %s1517_s29, %s2090_s3 }
  0x14   : > { %p1520_p0 = pnand %p1519_p13, %p1518_p12 }
  0x16   : > { %p1521_p3 = pneg %p1520_p0 }
  0x18   : > { %p1526_p7 = pnand %p1524_p5, %p1521_p3 }
  0x1a   : > { %1529 = shalt.err (!%p1526_p7)
}
  0x1b   : > { %s1530_s22 = scalar_lea.vmem %s1788_s23, 192  ;;  %p1538_p2 = scmp.lt.s32.totalorder %s1788_s23, %s1788_s23 }
  0x1c   : > { %p1531_p9 = scmp.ne.s32.totalorder %s1788_s23, %s1530_s22  ;;  %p1539_p12 = scmp.lt.s32.totalorder %s1530_s22, %s1530_s22 }
  0x1e   : > { %p1533_p10 = pnand %p1531_p9, %p1519_p13  ;;  %p1540_p0 = por %p1539_p12, %p1538_p2 }
  0x20   : > { %p1534_p1 = pneg %p1533_p10 }
  0x22   : > { %p1541_p6 = pnand %p1540_p0, %p1534_p1 }
  0x24   : > { %1544 = shalt.err (!%p1541_p6)
}
  0x25   : > { %s1677_s25 = smov 64   ;;  %s1678_s27 = smov 4  }
  0x26   : > { %1430 = dma.hbm_to_vmem [thread:$0]  (!%p1795_p11), %s2090_s3, 192, %s1788_s23, [#allocation6], %s1677_s25, %s1677_s25, %s1678_s27  }
  0x27   : > { %s1545_s12 = scalar_lea.hbm %s2091_s4, 192 }
  0x28   : > { %p1546_p2 = scmp.ne.s32.totalorder %s2091_s4, %s1545_s12  ;;  %p1552_p10 = scmp.lt.u32.totalorder %s1545_s12, %s2091_s4 }
  0x2a   : > { %p1548_p1 = pnand %p1546_p2, %p1519_p13 }
  0x2c   : > { %p1549_p6 = pneg %p1548_p1 }
  0x2e   : > { %p1554_p3 = pnand %p1552_p10, %p1549_p6 }
  0x30   : > { %1557 = shalt.err (!%p1554_p3)
}
  0x31   : > { %s1558_s23 = scalar_lea.vmem %s1799_s26, 192  ;;  %p1566_p12 = scmp.lt.s32.totalorder %s1799_s26, %s1799_s26 }
  0x32   : > { %p1559_p5 = scmp.ne.s32.totalorder %s1799_s26, %s1558_s23  ;;  %p1567_p0 = scmp.lt.s32.totalorder %s1558_s23, %s1558_s23 }
  0x34   : > { %p1561_p7 = pnand %p1559_p5, %p1519_p13  ;;  %p1568_p2 = por %p1567_p0, %p1566_p12 }
  0x36   : > { %p1562_p9 = pneg %p1561_p7 }
  0x38   : > { %p1569_p1 = pnand %p1568_p2, %p1562_p9 }
  0x3a   : > { %1572 = shalt.err (!%p1569_p1)
}
  0x3b   : > { %1433 = dma.hbm_to_vmem [thread:$0]  (!%p1795_p11), %s2091_s4, 192, %s1799_s26, [#allocation6], %s1677_s25, %s1677_s25, %s1678_s27  }
  0x3c   : > { %s1854_s28 = sadd.s32 1, %s1673_s16   ;;  %s34_s24 = sadd.s32 1, %s1669_s15 }
  0x3d   : > { %s31_s29 = ssub.s32 %s1673_s16, %s1854_s28  ;;  %p41_p13 = scmp.ne.s32.totalorder %s1669_s15, %s1665_s14 }
  0x3e   : > { %p32_p6 = scmp.eq.s32.totalorder %s31_s29, 0  ;;  %p42_p10 = scmp.eq.s32.totalorder %s1673_s16, 0 }
  0x3f   : > { %p2109_p3 = scmp.eq.s32.totalorder %s1765_s17, 1  ;;  %p1444_p7 = scmp.lt.s32.totalorder %s1673_s16, 2 }
  0x40   : > { %s1870_s11 = scalar_select %p32_p6, %s1669_s15, %s34_s24  }
  0x41   : > { %p1864_p5 = por %p2109_p3, %p41_p13  ;;  %p43_p9 = por %p42_p10, %p41_p13 }
  0x42   : > { %s335_s12 = sand.u32 1, %s1669_s15   ;;  %s1270_s26 = sshll.u32 %s1673_s16, 6 }
  0x43   : > { %s2110_s30 = scalar_select %p1864_p5, 1, 0 }
  0x44   : > { %s1269_s18 = sshll.u32 %s335_s12, 2  ;;  %s1877_s22 = scalar_lea.hbm %s2087_s0, %s1270_s26 }
  0x45   : > { %s339_s23 = scalar_lea.vmem [#allocation2], %s1269_s18  ;;  %p1881_p11 = pnand %p1444_p7, %p43_p9 }
  0x46   : > { %s346_s13 = sshll.u32 %s339_s23, 4  ;;  %s336_s24 = scalar_lea.sflag [#allocation3], %s335_s12  ;;  %s1879_s13 = int_to_ptr.vmem [resolvable:$true] %s346_s13 }
  0x47   : > { %s1573_s29 = scalar_lea.hbm %s1877_s22, 64  ;;  %p1575_p0 = pneg %p1881_p11 }
  0x48   : > { %p1574_p12 = scmp.ne.s32.totalorder %s1877_s22, %s1573_s29  ;;  %s1578_s25 = scalar_lea.hbm %s2087_s0, 128 }
  0x49   : > { %p1579_p13 = scmp.lt.u32.totalorder %s1877_s22, %s2087_s0  ;;  %p1580_p6 = scmp.lt.u32.totalorder %s1578_s25, %s1573_s29 }
  0x4a   : > { %p1576_p2 = pnand %p1575_p0, %p1574_p12  ;;  %p1582_p3 = scmp.lt.u32.totalorder %s1573_s29, %s1877_s22 }
  0x4b   : > { %p1581_p10 = por %p1580_p6, %p1579_p13 }
  0x4c   : > { %p1577_p1 = pneg %p1576_p2 }
  0x4d   : > { %p1583_p7 = por %p1582_p3, %p1581_p10 }
  0x4f   : > { %p1584_p9 = pnand %p1583_p7, %p1577_p1 }
  0x51   : > { %1587 = shalt.err (!%p1584_p9)
}
  0x52   : > { %s1588_s12 = scalar_lea.vmem %s1879_s13, 64  ;;  %s1679_s26 = smov [#allocation2]  }
  0x53   : > { %p1589_p12 = scmp.ne.s32.totalorder %s1879_s13, %s1588_s12  ;;  %s1593_s18 = sshll.u32 %s1679_s26, 4  ;;  %s1594_s18 = int_to_ptr.vmem [resolvable:$false] %s1593_s18 }
  0x54   : > { %s1595_s27 = scalar_lea.vmem %s1594_s18, 128  ;;  %p1596_p4 = scmp.lt.s32.totalorder %s1879_s13, %s1594_s18 }
  0x55   : > { %p1591_p2 = pnand %p1589_p12, %p1575_p0  ;;  %p1597_p13 = scmp.lt.s32.totalorder %s1595_s27, %s1588_s12 }
  0x57   : > { %p1592_p5 = pneg %p1591_p2  ;;  %p1598_p6 = por %p1597_p13, %p1596_p4 }
  0x59   : > { %p1599_p10 = pnand %p1598_p6, %p1592_p5 }
  0x5b   : > { %1602 = shalt.err (!%p1599_p10)
}
  0x5c   : > { %1437 = dma.hbm_to_vmem [thread:$0]  (!%p1881_p11), %s1877_s22, 64, %s1879_s13, %s336_s24  }
  0x5d   : > { %364 = sbr.rel (%p1784_p8) target bundleno = 1549 (0x60d), region = 60  ;;  %s1913_s29 = sand.u32 (!%p1784_p8), 1, %s1665_s14  }
  0x5e   : > { %s1272_s25 = sshll.u32 (!%p1784_p8), %s1913_s29, 2  ;;  %s367_s23 = scalar_lea.sflag (!%p1784_p8), [#allocation3], %s1913_s29 }
  0x5f   : > { %s370_s12 = scalar_lea.vmem (!%p1784_p8), [#allocation2], %s1272_s25  ;;  %p2112_p4 = scmp.ne.s32.totalorder (!%p1784_p8), %s2104_s19, 0 }
  0x64   : > { %1648 = dma.done.wait (%p2112_p4), %s367_s23, 64  }
  0x65   : > { %1650 = vsyncadd (%p2112_p4), %s367_s23, 4294967232  ;;  %p2113_p5 = scmp.eq.s32.totalorder %s1765_s17, 0 }
  0x67   : > { %1652 = dma.done.wait (%p2113_p5), [#allocation6], 384   ;;  %p2114_p11 = pmov %p2113_p5 }
  0x68   : > { %v1680_v0 = vmov 0.0   ;;  %s1276_s21 = sshll.u32 %s1765_s17, 1  ;;  %vm1681_vm0 = vmmov 0   ;;  %v1492_v1 = vld [vmem:[%s2089_s2] sm:$0xff]   ;;  %v1493_v2 = vld [vmem:[#allocation5] sm:$0xff]   ;;  %vm526_vm1 = vcmask 1043456  }
  0x69   : > { %1654 = vsyncadd (%p2114_p11), [#allocation6], 4294966912  ;;  %1335 = vmatprep.subr.bf16.mxu0 %v1680_v0  ;;  %1343 = vmatprep.subr.bf16.mxu1 %v1680_v0  ;;  %p421_p8 = scmp.lt.s32.totalorder %s1276_s21, 3  ;;  %v1494_v3 = vld [vmem:[%s2089_s2 + $0x8] sm:$0xff]   ;;  %v1495_v4 = vld [vmem:[#allocation5 + $0x8] ss:$0 sps:$4 sm:$0xff]  }
  0x6a   : > { %1339 = vmatprep.mubr.msk.bf16.mxu0 %vm1681_vm0, %v1680_v0  ;;  %1347 = vmatprep.mubr.msk.bf16.mxu1 %vm1681_vm0, %v1680_v0  ;;  %vm453_vm2 = vcmask 261120   ;;  %vm522_vm3 = vcmask 195584   ;;  %v528_v5 = vsel %vm526_vm1, %v1495_v4, 0  ;;  %v427_v6 = vld [vmem:[%s370_s12] sm:$0xf]  ;;  %v1497_v8 = vld [vmem:[#allocation7] sm:$0xff]  }
  0x6b   : > { %s2125_s21 = smov (!%p421_p8, %s1276_s21), 3  ;;  %1336 = vmatpush3.bf16.msra.mxu0 %v1492_v1  ;;  %1344 = vmatpush3.bf16.msra.mxu1 %v1493_v2  ;;  %v1498_v9 = vld [vmem:[#allocation7 + $0x8] ss:$0 sps:$4 sm:$0xff]   ;;  %v1278_v11 = vld [vmem:[%s2093_s6] ss:$0 sm:$0xff]  ;;  %vm660_vm4 = vcmask 64512  }
  0x6c   : > { %s1277_s19 = sshll.u32 %s2125_s21, 2  ;;  %1337 = vmatprep.subr.bf16.mxu0 %v1680_v0  ;;  %1345 = vmatprep.subr.bf16.mxu1 %v1680_v0  ;;  %v592_v10 = vsel %vm526_vm1, %v1498_v9, 0  ;;  %v1282_v14 = vld [vmem:[%s2094_s7] ss:$0 sm:$0xff]  ;;  %s1683_s22 = smov 104   ;;  %vm845_vm5 = vcmask 130048  }
  0x6d   : > { %s424_s27 = scalar_lea.vmem %s2088_s1, %s1277_s19  ;;  %s1682_s19 = smov 120   ;;  %v1287_v27 = vld [vmem:[%s2095_s8] ss:$0 sm:$0xff] }
  0x6e   : > { %v1496_v7 = vld [vmem:[%s424_s27] sm:$0xff]   ;;  %s1684_s13 = smov 112   ;;  %s1685_s23 = smov 8  }
  0x6f   : > { %1338 = vmatpush3.bf16.msra.mxu0 %v1494_v3  ;;  %1346 = vmatpush3.bf16.msra.mxu1 %v528_v5  ;;  %s1686_s12 = smov 16   ;;  %s1687_s21 = smov 24  }
  0x70   : > { %1351 = vmatprep.subr.bf16.mxu0 %v1680_v0  ;;  %1359 = vmatprep.subr.bf16.mxu1 %v1680_v0  ;;  %s1304_s20 = sshll.u32 %s1765_s17, 7  ;;  %s1150_s17 = scalar_lea.sflag [#allocation4], %s1913_s29 }
  0x71   : > { %s2042_s25 = scalar_lea.hbm %s2097_s10, %s1304_s20  ;;  %p2115_p1 = scmp.ne.s32.totalorder %s2110_s30, 0 }
  0x72   : > { %1340 = vmatmul.mubr.msk.bf16.vlgmr.msra.gmra.mrb[0].mxu0 %vm453_vm2, %v427_v6  ;;  %1348 = vmatmul.mubr.msk.bf16.vlgmr.msra.gmra.mrb[0].mxu1 %vm522_vm3, %v1496_v7 }
  0x73   : > { %1355 = vmatprep.mubr.msk.bf16.mxu0 %vm1681_vm0, %v1680_v0  ;;  %1361 = vmatprep.mubr.msk.bf16.mxu1 %vm1681_vm0, %v1680_v0 }
  0x74   : > { %1352 = vmatpush3.bf16.msra.mxu0 %v1497_v8 }
  0x75   : > { %1353 = vmatprep.subr.bf16.mxu0 %v1680_v0 }
  0x78   : > { %1354 = vmatpush3.bf16.msra.mxu0 %v592_v10 }
  0x79   : > { %1365 = vmatprep.subr.bf16.mxu0 %v1680_v0 }
  0x7b   : > { %1356 = vmatmul.mubr.msk.bf16.vlgmr.msra.gmra.mrb[4].mxu0 %vm522_vm3, %v1496_v7 }
  0x7c   : > { %1367 = vmatprep.mubr.msk.bf16.mxu0 %vm1681_vm0, %v1680_v0 }
 0x145   : > { %v491_v12 = vpop.f32.mrb[0].mxu0  ;;  %v564_v15 = vpop.f32.mrb[0].mxu1 }
 0x146   : > { %v492_v13 = vadd.f32 %v1278_v11, %v491_v12  ;;  %v1341_v16 = vpop.f32.mrb[1].mxu0  ;;  %v1349_v17 = vpop.f32.mrb[1].mxu1  ;;  %v565_v22 = vadd.f32 %v1282_v14, %v564_v15 }
 0x147   : > { %v494_v18 = vpop.f32.mrb[2].mxu0  ;;  %v567_v20 = vpop.f32.mrb[2].mxu1 }
 0x148   : > { %v497_v19 = vpack.c.bf16 %v492_v13, %v492_v13  ;;  %v1342_v21 = vpop.f32.mrb[3].mxu0  ;;  %v568_v23 = vadd.f32 %v1282_v14, %v567_v20  ;;  %v1350_v24 = vpop.f32.mrb[3].mxu1 }
 0x14a   : > { %637 = vrot.lane.b32.xlu1 %v497_v19, %s1682_s19  ;;  %v571_v25 = vpack.c.bf16 %v568_v23, %v565_v22 }
 0x14c   : > { %644 = vrot.lane.b32.xlu0 %v571_v25, %s1682_s19  ;;  %v665_v26 = vsel %vm660_vm4, %v571_v25, 0 }
 0x14d   : > { %1360 = vmatpush3.bf16.xpose.msra.mxu1 %v665_v26 }
 0x14e   : > { %648 = vrot.lane.b32.xlu1 %v571_v25, %s1683_s22  ;;  %1371 = vmatprep.subr.bf16.mxu1 %v1680_v0  ;;  %v628_v28 = vpop.f32.mrb[4].mxu0 }
 0x14f   : > { %v629_v29 = vadd.f32 %v1287_v27, %v628_v28  ;;  %v1357_v30 = vpop.f32.mrb[5].mxu0 }
 0x150   : > { %646 = vrot.lane.b32.xlu0 %v571_v25, %s1684_s13  ;;  %v631_v31 = vpop.f32.mrb[6].mxu0 }
 0x151   : > { %v632_v32 = vadd.f32 %v1287_v27, %v631_v31  ;;  %v1358_v33 = vpop.f32.mrb[7].mxu0 }
 0x152   : > { %641 = vrot.lane.b32.xlu1 %v497_v19, %s1683_s22 }
 0x153   : > { %v1978_v34 = vpack.c.bf16 %v632_v32, %v629_v29 }
 0x154   : > { %639 = vrot.lane.b32.xlu0 %v497_v19, %s1684_s13  ;;  %1362 = vmatmul.mubr.msk.bf16.vlgmr.msra.gmra.mrb[4].mxu1 %vm660_vm4, %v497_v19 }
 0x155   : > { %1373 = vmatprep.mubr.msk.bf16.mxu1 %vm1681_vm0, %v1680_v0 }
 0x1bc   : > { %v638_v35 = vpop.permute.xlu1 %637 }
 0x1be   : > { %v645_v36 = vpop.permute.xlu0 %644 }
 0x1bf   : > { %v711_v37 = vsel %vm660_vm4, %v645_v36, 0 }
 0x1c0   : > { %1366 = vmatpush3.bf16.xpose.msra.mxu0 %v711_v37  ;;  %v649_v40 = vpop.permute.xlu1 %648 }
 0x1c1   : > { %1377 = vmatprep.subr.bf16.mxu0 %v1680_v0  ;;  %v803_v41 = vsel %vm660_vm4, %v649_v40, 0 }
 0x1c2   : > { %v647_v38 = vpop.permute.xlu0 %646 }
 0x1c3   : > { %v757_v39 = vsel %vm660_vm4, %v647_v38, 0 }
 0x1c4   : > { %1372 = vmatpush3.bf16.xpose.msra.mxu1 %v757_v39  ;;  %v642_v43 = vpop.permute.xlu1 %641 }
 0x1c5   : > { %1383 = vmatprep.subr.bf16.mxu1 %v1680_v0 }
 0x1c6   : > { %v640_v42 = vpop.permute.xlu0 %639 }
 0x1c7   : > { %1368 = vmatmul.mubr.msk.bf16.vlgmr.msra.gmra.mrb[8].mxu0 %vm660_vm4, %v638_v35 }
 0x1c8   : > { %1378 = vmatpush3.bf16.xpose.msra.mxu0 %v803_v41  ;;  %1379 = vmatprep.mubr.msk.bf16.mxu0 %vm1681_vm0, %v1680_v0 }
 0x1c9   : > { %1389 = vmatprep.subr.bf16.mxu0 %v1680_v0 }
 0x1cb   : > { %1374 = vmatmul.mubr.msk.bf16.vlgmr.msra.gmra.mrb[8].mxu1 %vm660_vm4, %v640_v42 }
 0x1cc   : > { %1384 = vmatpush3.bf16.msra.mxu1 %v1978_v34  ;;  %1385 = vmatprep.mubr.msk.bf16.mxu1 %vm1681_vm0, %v1680_v0 }
 0x1cd   : > { %1395 = vmatprep.subr.bf16.mxu1 %v1680_v0 }
 0x1cf   : > { %1380 = vmatmul.mubr.msk.bf16.vlgmr.msra.gmra.mrb[12].mxu0 %vm660_vm4, %v642_v43 }
 0x1d0   : > { %1391 = vmatprep.mubr.msk.bf16.mxu0 %vm1681_vm0, %v1680_v0 }
 0x227   : > { %v701_v44 = vpop.f32.mrb[4].mxu1 }
 0x228   : > { %v1363_v45 = vpop.f32.mrb[5].mxu1  ;;  %v846_v46 = vsel %vm845_vm5, %v701_v44, -inf }
 0x229   : > { %847 = vmax.xlane.f32.xlu0 %v846_v46  ;;  %v704_v47 = vpop.f32.mrb[6].mxu1  ;;  %v1500_v45 = vld [vmem:[%s2092_s5 + $0x8] sm:$0xff]  }
 0x22a   : > { %v1364_v48 = vpop.f32.mrb[7].mxu1 }
 0x29a   : > { %v747_v49 = vpop.f32.mrb[8].mxu0 }
 0x29b   : > { %v1369_v50 = vpop.f32.mrb[9].mxu0  ;;  %v849_v51 = vsel %vm845_vm5, %v747_v49, -inf }
 0x29c   : > { %850 = vmax.xlane.f32.xlu1 %v849_v51  ;;  %v750_v52 = vpop.f32.mrb[10].mxu0 }
 0x29d   : > { %v1370_v53 = vpop.f32.mrb[11].mxu0 }
 0x29e   : > { %v793_v54 = vpop.f32.mrb[8].mxu1 }
 0x29f   : > { %v1375_v55 = vpop.f32.mrb[9].mxu1  ;;  %v852_v56 = vsel %vm845_vm5, %v793_v54, -inf }
 0x2a0   : > { %853 = vmax.xlane.f32.xlu0 %v852_v56  ;;  %v796_v57 = vpop.f32.mrb[10].mxu1 }
 0x2a1   : > { %v1376_v58 = vpop.f32.mrb[11].mxu1 }
 0x2a2   : > { %v839_v59 = vpop.f32.mrb[12].mxu0 }
 0x2a3   : > { %v1381_v60 = vpop.f32.mrb[13].mxu0  ;;  %v855_v61 = vsel %vm845_vm5, %v839_v59, -inf }
 0x2a4   : > { %856 = vmax.xlane.f32.xlu0 %v855_v61  ;;  %v842_v62 = vpop.f32.mrb[14].mxu0 }
 0x2a5   : > { %v1382_v63 = vpop.f32.mrb[15].mxu0 }
 0x2ad   : > { %651 = vrot.lane.b32.xlu1 %v1978_v34, %s1682_s19  ;;  %s1275_s19 = sshll.u32 %s1913_s29, 3 }
 0x2ae   : > { %s419_s24 = scalar_lea.vmem [#allocation8], %s1275_s19 }
 0x2af   : > { %s1163_s26 = sshll.u32 %s419_s24, 4  ;;  %s2044_s26 = int_to_ptr.vmem [resolvable:$true] %s1163_s26 }
 0x2b6   : > { %v848_v1 = vpop.xlane.xlu0 %847 }
 0x2b7   : > { %v858_v2 = vsub.f32 %v701_v44, %v848_v1  ;;  %v1499_v44 = vld [vmem:[%s2092_s5] sm:$0xff]  }
 0x2b8   : > { %v1299_v1 = vld [vmem:[%s2096_s9] ss:$0 sm:$0xff] }
 0x2b9   : > { %v862_v3 = vmul.f32 1.442695, %v858_v2 }
 0x2bb   : > { %1501 = vpow2.f32 %v862_v3 }
 0x2c5   : > { %v1502_v4 = vpop.eup %1501 }
 0x2c6   : > { %v870_v5 = vsel %vm845_vm5, %v1502_v4, 0.0 }
 0x2d1   : > { %871 = vadd.xlane.f32.xlu1 %v870_v5 }
 0x329   : > { %v851_v6 = vpop.xlane.xlu1 %850 }
 0x32a   : > { %v859_v7 = vsub.f32 %v747_v49, %v851_v6 }
 0x32c   : > { %v864_v8 = vmul.f32 1.442695, %v859_v7 }
 0x32d   : > { %v854_v9 = vpop.xlane.xlu0 %853  ;;  %v652_v10 = vpop.permute.xlu1 %651 }
 0x32e   : > { %1503 = vpow2.f32 %v864_v8  ;;  %v860_v11 = vsub.f32 %v793_v54, %v854_v9  ;;  %1390 = vmatpush3.bf16.msra.mxu0 %v652_v10 }
 0x32f   : > { %1401 = vmatprep.subr.bf16.mxu0 %v1680_v0 }
 0x330   : > { %v866_v12 = vmul.f32 1.442695, %v860_v11 }
 0x331   : > { %v857_v13 = vpop.xlane.xlu0 %856 }
 0x332   : > { %1505 = vpow2.f32 %v866_v12  ;;  %v861_v14 = vsub.f32 %v839_v59, %v857_v13 }
 0x334   : > { %v868_v15 = vmul.f32 1.442695, %v861_v14 }
 0x336   : > { %1507 = vpow2.f32 %v868_v15 }
 0x338   : > { %v1504_v16 = vpop.eup %1503 }
 0x339   : > { %v873_v17 = vsel %vm845_vm5, %v1504_v16, 0.0 }
 0x33a   : > { %874 = vadd.xlane.f32.xlu0 %v873_v17 }
 0x33c   : > { %v1506_v18 = vpop.eup %1505 }
 0x33d   : > { %v876_v19 = vsel %vm845_vm5, %v1506_v18, 0.0 }
 0x33e   : > { %877 = vadd.xlane.f32.xlu1 %v876_v19 }
 0x340   : > { %v1508_v20 = vpop.eup %1507 }
 0x341   : > { %v879_v21 = vsel %vm845_vm5, %v1508_v20, 0.0 }
 0x342   : > { %880 = vadd.xlane.f32.xlu0 %v879_v21 }
 0x34f   : > { %657 = vrot.lane.b32.xlu1 %v1978_v34, %s1683_s22 }
 0x358   : > { %654 = vrot.lane.b32.xlu0 %v1978_v34, %s1684_s13 }
 0x35e   : > { %v872_v22 = vpop.xlane.xlu1 %871 }
 0x35f   : > { %1509 = vrcp.f32 %v872_v22 }
 0x369   : > { %v1510_v23 = vpop.eup %1509 }
 0x36a   : > { %v886_v24 = vmul.f32 %v1510_v23, %v1502_v4 }
 0x36c   : > { %v890_v25 = vpack.c.bf16 %v886_v24, %v886_v24 }
 0x36e   : > { %1386 = vmatmul.mubr.msk.bf16.vlgmr.msra.gmra.mrb[12].mxu1 %vm845_vm5, %v890_v25 }
 0x36f   : > { %1397 = vmatprep.mubr.msk.bf16.mxu1 %vm1681_vm0, %v1680_v0 }
 0x3c7   : > { %v875_v26 = vpop.xlane.xlu0 %874 }
 0x3c8   : > { %1511 = vrcp.f32 %v875_v26 }
 0x3cb   : > { %v878_v27 = vpop.xlane.xlu1 %877 }
 0x3cc   : > { %1513 = vrcp.f32 %v878_v27 }
 0x3cf   : > { %v881_v28 = vpop.xlane.xlu0 %880  ;;  %v658_v35 = vpop.permute.xlu1 %657 }
 0x3d0   : > { %1515 = vrcp.f32 %v881_v28 }
 0x3d2   : > { %v1512_v29 = vpop.eup %1511 }
 0x3d3   : > { %v887_v30 = vmul.f32 %v1512_v29, %v1504_v16  ;;  %v655_v31 = vpop.permute.xlu0 %654 }
 0x3d4   : > { %1396 = vmatpush3.bf16.msra.mxu1 %v655_v31 }
 0x3d5   : > { %v891_v32 = vpack.c.bf16 %v887_v30, %v887_v30  ;;  %1407 = vmatprep.subr.bf16.mxu1 %v1680_v0 }
 0x3d6   : > { %v1514_v33 = vpop.eup %1513 }
 0x3d7   : > { %v888_v34 = vmul.f32 %v1514_v33, %v1506_v18  ;;  %1392 = vmatmul.mubr.msk.bf16.vlgmr.msra.gmra.mrb[16].mxu0 %vm845_vm5, %v891_v32 }
 0x3d8   : > { %1402 = vmatpush3.bf16.msra.mxu0 %v658_v35  ;;  %1403 = vmatprep.mubr.msk.bf16.mxu0 %vm1681_vm0, %v1680_v0 }
 0x3d9   : > { %v892_v36 = vpack.c.bf16 %v888_v34, %v888_v34 }
 0x3da   : > { %v1516_v37 = vpop.eup %1515 }
 0x3db   : > { %v889_v38 = vmul.f32 %v1516_v37, %v1508_v20  ;;  %1398 = vmatmul.mubr.msk.bf16.vlgmr.msra.gmra.mrb[16].mxu1 %vm845_vm5, %v892_v36 }
 0x3dc   : > { %1411 = vmatprep.mubr.msk.bf16.mxu1 %vm1681_vm0, %v1680_v0  ;;  %1408 = vmatpush3.bf16.msra.mxu1 %v1499_v44 }
 0x3dd   : > { %v893_v39 = vpack.c.bf16 %v889_v38, %v889_v38  ;;  %1409 = vmatprep.subr.bf16.mxu1 %v1680_v0 }
 0x3df   : > { %1404 = vmatmul.mubr.msk.bf16.vlgmr.msra.gmra.mrb[20].mxu0 %vm845_vm5, %v893_v39 }
 0x3e0   : > { %1410 = vmatpush3.bf16.msra.mxu1 %v1500_v45 }
 0x441   : > { %v931_v40 = vpop.f32.mrb[12].mxu1 }
 0x442   : > { %v1387_v41 = vpop.f32.mrb[13].mxu1 }
 0x443   : > { %v934_v42 = vpop.f32.mrb[14].mxu1 }
 0x444   : > { %v1388_v43 = vpop.f32.mrb[15].mxu1 }
 0x4aa   : > { %v974_v46 = vpop.f32.mrb[16].mxu0 }
 0x4ab   : > { %1067 = vrot.lane.b32.xlu1 %v974_v46, %s1685_s23  ;;  %v1393_v47 = vpop.f32.mrb[17].mxu0  ;;  %s1603_s23 = scalar_lea.vmem %s2044_s26, 128 }
 0x4ac   : > { %v977_v48 = vpop.f32.mrb[18].mxu0  ;;  %p1604_p0 = scmp.ne.s32.totalorder %s2044_s26, %s1603_s23 }
 0x4ad   : > { %v1394_v49 = vpop.f32.mrb[19].mxu0 }
 0x4ae   : > { %v1017_v50 = vpop.f32.mrb[16].mxu1  ;;  %p1605_p3 = pnand %p1604_p0, %p2115_p1 }
 0x4af   : > { %1071 = vrot.lane.b32.xlu0 %v1017_v50, %s1686_s12  ;;  %v1399_v51 = vpop.f32.mrb[17].mxu1  ;;  %s1688_s12 = smov [#allocation8]  }
 0x4b0   : > { %v1020_v52 = vpop.f32.mrb[18].mxu1  ;;  %p1606_p7 = pneg %p1605_p3 }
 0x4b1   : > { %v1400_v53 = vpop.f32.mrb[19].mxu1 }
 0x4b2   : > { %v1060_v54 = vpop.f32.mrb[20].mxu0 }
 0x4b3   : > { %1075 = vrot.lane.b32.xlu1 %v1060_v54, %s1687_s21  ;;  %v1405_v0 = vpop.f32.mrb[21].mxu0  ;;  %s1607_s21 = sshll.u32 %s1688_s12, 4  ;;  %s1608_s21 = int_to_ptr.vmem [resolvable:$false] %s1607_s21 }
 0x4b4   : > { %v1063_v55 = vpop.f32.mrb[22].mxu0  ;;  %s1609_s19 = scalar_lea.vmem %s1608_s21, 256  ;;  %p1610_p9 = scmp.lt.s32.totalorder %s2044_s26, %s1608_s21 }
 0x4b5   : > { %v1406_v56 = vpop.f32.mrb[23].mxu0  ;;  %p1611_p12 = scmp.lt.s32.totalorder %s1609_s19, %s1603_s23 }
 0x4b7   : > { %p1612_p2 = por %p1611_p12, %p1610_p9 }
 0x4b9   : > { %p1613_p13 = pnand %p1612_p2, %p1606_p7 }
 0x51d   : > { %v1068_v57 = vpop.permute.xlu1 %1067 }
 0x51e   : > { %v1078_v59 = vsel %vm660_vm4, %v931_v40, %v1068_v57 }
 0x521   : > { %v1072_v58 = vpop.permute.xlu0 %1071 }
 0x522   : > { %v1079_v60 = vsel %vm845_vm5, %v1078_v59, %v1072_v58 }
 0x525   : > { %v1076_v61 = vpop.permute.xlu1 %1075 }
 0x526   : > { %v1080_v62 = vsel %vm522_vm3, %v1079_v60, %v1076_v61 }
 0x527   : > { %v1081_v63 = vpack.c.bf16 %v1080_v62, %v1080_v62 }
 0x529   : > { %1412 = vmatmul.mubr.msk.bf16.vlgmr.msra.gmra.mrb[20].mxu1 %vm453_vm2, %v1081_v63 }
 0x5fc   : > { %v1142_v2 = vpop.f32.mrb[20].mxu1 }
 0x5fd   : > { %v1143_v3 = vadd.f32 %v1299_v1, %v1142_v2  ;;  %v1413_v4 = vpop.f32.mrb[21].mxu1 }
 0x5fe   : > { %v1145_v5 = vpop.f32.mrb[22].mxu1 }
 0x5ff   : > { %v1414_v6 = vpop.f32.mrb[23].mxu1  ;;  %1148 = vst.msk [vmem:[%s419_s24] sm:$0xff] %vm453_vm2, %v1143_v3 }
 0x600   : > { %1616 = shalt.err (!%p1613_p13)
}
 0x601   : > { %s1617_s29 = scalar_lea.hbm %s2042_s25, 128  ;;  %s1621_s20 = scalar_lea.hbm %s2097_s10, 256 }
 0x602   : > { %p1618_p6 = scmp.ne.s32.totalorder %s2042_s25, %s1617_s29  ;;  %p1622_p5 = scmp.lt.u32.totalorder %s2042_s25, %s2097_s10 }
 0x603   : > { %p1623_p11 = scmp.lt.u32.totalorder %s1621_s20, %s1617_s29  ;;  %p1625_p0 = scmp.lt.u32.totalorder %s1617_s29, %s2042_s25 }
 0x604   : > { %p1619_p10 = pnand %p1618_p6, %p2115_p1 }
 0x605   : > { %p1624_p8 = por %p1623_p11, %p1622_p5 }
 0x606   : > { %p1620_p4 = pneg %p1619_p10 }
 0x607   : > { %p1626_p3 = por %p1625_p0, %p1624_p8 }
 0x609   : > { %p1627_p7 = pnand %p1626_p3, %p1620_p4 }
 0x60b   : > { %1630 = shalt.err (!%p1627_p7)
}
 0x60c   : > { %1425 = dma.vmem_to_hbm [thread:$0]  (%p2115_p1), %s2044_s26, 128, %s2042_s25, %s1150_s17  }
 0x60d PF: > { %s2116_s27 = sld [smem:[#allocation12_spill]]  ;;  %s2117_s23 = sld [smem:[#allocation13_spill]] }
 0x60e   : > { %p2119_p12 = scmp.ge.s32.totalorder %s1673_s16, 2 }
 0x613   : > { %s1175_s12 = sand.u32 1, %s2116_s27   ;;  %p2118_p9 = scmp.ne.s32.totalorder %s2117_s23, 0 }
 0x614   : > { %s1176_s21 = scalar_lea.sflag [#allocation4], %s1175_s12 }
 0x615   : > { %p1439_p2 = pnand %p2119_p12, %p2118_p9 }
 0x617   : > { %1656 = dma.done.wait (!%p1439_p2), %s1176_s21, 128  }
 0x618   : > { %1658 = vsyncadd (!%p1439_p2), %s1176_s21, 4294967168  ;;  %p24_p13 = scmp.ge.s32.totalorder %s1854_s28, 4   ;;  %s2120_s13 = smov %s1665_s14 }
 0x619   : > { %s2121_s14 = smov %s1669_s15  ;;  %s2122_s15 = smov %s1870_s11 }
 0x61a   : > { %s2123_s16 = smov %s1854_s28  ;;  %26 = sbr.rel (!%p24_p13) target bundleno = 6 (0x6), region = 116 }
 0x621   :  { %1181 = vsyncpa [#allocation3], 1 }
 0x622   :  { %1183 = vsyncpa [#allocation3 + $0x1], 1 }
 0x623   :  { %1184 = vsyncpa [#allocation6], 1 }
 0x624   :  { %1185 = vsyncpa [#allocation4], 1 }
 0x625   :  { %1187 = vsyncpa [#allocation4 + $0x1], 1 }

</bundles_post_ra>
